<compile_context>
chip_gen: v7x
topology: tpu7x:2x2x1
jax: 0.10.0
libtpu: 0.0.40
codegen_flags: <defaults>
</compile_context>

<pallas_src>
import numpy as np
import jax
import jax.numpy as jnp
from jax.experimental import pallas as pl
from jax.experimental.pallas import tpu as pltpu


# --------------------------------------------------------------------------
# pltpu.roll direction probe (run once, eagerly, outside any jit trace)
# --------------------------------------------------------------------------

def _probe_roll_semantics():
    """True if pltpu.roll(x, s) == jnp.roll(x, s) (out[i] = x[i - s])."""
    def kern(x_ref, o_ref):
        o_ref[...] = pltpu.roll(x_ref[...], 3, axis=1)

    x_np = np.arange(8 * 128, dtype=np.float32).reshape(8, 128)
    vmem = pl.BlockSpec(memory_space=pltpu.MemorySpace.VMEM)
    out = pl.pallas_call(
        kern,
        out_shape=jax.ShapeDtypeStruct((8, 128), jnp.float32),
        in_specs=[vmem],
        out_specs=vmem,
    )(jnp.asarray(x_np))
    out = np.asarray(out)
    if np.array_equal(out, np.roll(x_np, 3, axis=1)):
        return True
    if np.array_equal(out, np.roll(x_np, -3, axis=1)):
        return False
    raise AssertionError("could not determine pltpu.roll shift direction")


_PLTPU_ROLL_MATCHES_JNP = _probe_roll_semantics()


# --------------------------------------------------------------------------
# helpers used inside the fused kernel (all operate on VMEM-resident values)
# --------------------------------------------------------------------------

def _border_masks(h_img, w_img, m_total):
    """Precompute the 3x3 halo validity masks for a resolution, keyed by (dy, dx).
    Each mask is (1, m_total) bool over the flat lane index n*H*W + h*W + w."""
    lane = jax.lax.broadcasted_iota(jnp.int32, (1, m_total), 1)
    hw = lane % (h_img * w_img)
    hh = hw // w_img
    ww = hw % w_img
    top = hh >= 1                 # needed when dy == -1
    bot = hh <= h_img - 2         # needed when dy == +1
    left = ww >= 1                # needed when dx == -1
    right = ww <= w_img - 2       # needed when dx == +1

    def combine(dy, dx):
        parts = []
        if dy == -1:
            parts.append(top)
        elif dy == 1:
            parts.append(bot)
        if dx == -1:
            parts.append(left)
        elif dx == 1:
            parts.append(right)
        if not parts:
            return None
        out = parts[0]
        for p in parts[1:]:
            out = jnp.logical_and(out, p)
        return out

    return {(dy, dx): combine(dy, dx) for dy in (-1, 0, 1) for dx in (-1, 0, 1)}


def _conv3x3(x, w_all, masks, img_w, m_total):
    """3x3 / stride 1 / pad 1 / no-bias conv on the flat layout.
    x: (Cin, M) f32, w_all: (9, Cout, Cin) bf16 (tap order ky-major, kx-minor),
    masks: dict from _border_masks.  Returns (Cout, M) f32.
    Each tap = lane roll (XLU) + border mask + bf16 cast + MXU matmul, accumulated in f32."""
    acc = None
    t = 0
    for dy in (-1, 0, 1):
        for dx in (-1, 0, 1):
            off = dy * img_w + dx
            if off == 0:
                xt = x
            else:
                shift = ((-off) % m_total) if _PLTPU_ROLL_MATCHES_JNP else (off % m_total)
                xt = pltpu.roll(x, shift, axis=1)
            msk = masks[(dy, dx)]
            if msk is not None:
                xt = jnp.where(msk, xt, 0.0)
            p = jnp.dot(w_all[t], xt.astype(jnp.bfloat16),
                        preferred_element_type=jnp.float32)
            acc = p if acc is None else acc + p
            t += 1
    return acc


def _bn_lrelu(y, gamma, beta, eps=1e-5):
    """Training-mode BatchNorm2d (single-pass stats over lanes = N,H,W; biased variance)
    fused with LeakyReLU(0.2).  y: (C, M) f32, gamma/beta: (C, 1) f32."""
    m = y.shape[1]
    inv_m = 1.0 / float(m)
    s1 = jnp.sum(y, axis=1, keepdims=True)
    s2 = jnp.sum(y * y, axis=1, keepdims=True)
    mean = s1 * inv_m
    var = s2 * inv_m - mean * mean
    scale = gamma * jax.lax.rsqrt(var + eps)
    shift = beta - mean * scale
    z = y * scale + shift
    return jnp.where(z >= 0.0, z, 0.2 * z)


def _upsample2x_flat(y, u, ut, n_batch, h_img):
    """Bilinear 2x upsample (PyTorch align_corners=False), flat in -> flat out.
    y: (C, N*H*W) f32, u: (2H, H), ut: (H, 2H).  Returns (C, N*2H*2W) f32.
    H direction via one batched einsum, W direction via one 2D dot (no transposes)."""
    c = y.shape[0]
    w_img = h_img                                    # inputs are square
    cn = c * n_batch
    y3 = y.reshape(cn, h_img, w_img)                 # (CN, H, W)
    ub = jnp.broadcast_to(u[None], (cn, 2 * h_img, h_img))
    t = jnp.einsum('boh,bhw->bow', ub, y3,
                   preferred_element_type=jnp.float32)          # (CN, 2H, W)
    t2 = t.reshape(cn * 2 * h_img, w_img)            # free: 2H is a multiple of 8
    z = jnp.dot(t2, ut, preferred_element_type=jnp.float32)     # (CN*2H, 2W)
    return z.reshape(c, n_batch * 2 * h_img * 2 * w_img)


def _stage(z, w_all, gamma, beta, u, ut, skip, n_batch, h_img):
    """conv3x3 -> BN -> LeakyReLU -> bilinear up2x -> channel-concat with skip image."""
    m = z.shape[1]
    masks = _border_masks(h_img, h_img, m)
    y = _conv3x3(z, w_all, masks, h_img, m)
    y = _bn_lrelu(y, gamma, beta)
    up = _upsample2x_flat(y, u, ut, n_batch, h_img)
    return jnp.concatenate([up, skip], axis=0)       # sublane-aligned (16+3 / 8+3)


# --------------------------------------------------------------------------
# the fused whole-network kernel (closure over static batch / image size)
# --------------------------------------------------------------------------

def _make_kernel(n_batch, img_size):
    h0 = img_size // 16

    def kernel(i4_ref, i8_ref, i16_ref, i32_ref, i64_ref,
               w11_ref, w21_ref, w31_ref, w41_ref, w51_ref, w52_ref,
               g11_ref, b11_ref, g21_ref, b21_ref, g31_ref, b31_ref,
               g41_ref, b41_ref, g51_ref, b51_ref,
               u4_ref, ut4_ref, u8_ref, ut8_ref, u16_ref, ut16_ref,
               u32_ref, ut32_ref, out_ref):
        z = _stage(i4_ref[...], w11_ref[...], g11_ref[...], b11_ref[...],
                   u4_ref[...], ut4_ref[...], i8_ref[...], n_batch, h0)
        z = _stage(z, w21_ref[...], g21_ref[...], b21_ref[...],
                   u8_ref[...], ut8_ref[...], i16_ref[...], n_batch, 2 * h0)
        z = _stage(z, w31_ref[...], g31_ref[...], b31_ref[...],
                   u16_ref[...], ut16_ref[...], i32_ref[...], n_batch, 4 * h0)
        z = _stage(z, w41_ref[...], g41_ref[...], b41_ref[...],
                   u32_ref[...], ut32_ref[...], i64_ref[...], n_batch, 8 * h0)

        # final full-resolution stage: conv51 + BN + LReLU, then conv52 (no BN / no tanh),
        # sharing one 64x64 border-mask set between both convs.
        m = z.shape[1]
        masks = _border_masks(img_size, img_size, m)
        y = _conv3x3(z, w51_ref[...], masks, img_size, m)
        y = _bn_lrelu(y, g51_ref[...], b51_ref[...])
        out = _conv3x3(y, w52_ref[...], masks, img_size, m)
        out_ref[...] = out.astype(out_ref.dtype)     # lane-dense (out_nc, N*H*W) store

    return kernel


# --------------------------------------------------------------------------
# host-side glue
# --------------------------------------------------------------------------

def _upsample_matrix_np(n):
    # PyTorch bilinear, scale 2, align_corners=False: src = (o+0.5)/2 - 0.5, clamped at 0
    out = 2 * n
    src = (np.arange(out, dtype=np.float64) + 0.5) / 2.0 - 0.5
    src = np.maximum(src, 0.0)
    i0 = np.floor(src).astype(np.int64)
    frac = src - i0
    i1 = np.minimum(i0 + 1, n - 1)
    U = np.zeros((out, n), np.float32)
    U[np.arange(out), i0] += (1.0 - frac).astype(np.float32)
    U[np.arange(out), i1] += frac.astype(np.float32)
    return U


def netT64_forward(params, Is_nchw):
    """Is_nchw: (N, in_nc, 64, 64) NCHW like PyTorch.  Returns NCHW output."""
    N, in_nc, H, W = Is_nchw.shape
    assert H == W and H % 16 == 0
    out_nc = params['conv52'].shape[0]

    # image pyramid (AvgPool2d(2,2) chain), channels-first then flattened (C, N*h*w)
    x64 = jnp.transpose(Is_nchw.astype(jnp.float32), (1, 0, 2, 3))

    def pool(v):
        c, n, h, w = v.shape
        return v.reshape(c, n, h // 2, 2, w // 2, 2).mean(axis=(3, 5))

    x32 = pool(x64); x16 = pool(x32); x8 = pool(x16); x4 = pool(x8)
    flat = lambda v: v.reshape(v.shape[0], -1)
    i4, i8, i16, i32, i64 = flat(x4), flat(x8), flat(x16), flat(x32), flat(x64)

    # conv weights (Cout, Cin, 3, 3) -> (9, Cout, Cin) bf16, tap order (ky, kx)
    def w9(name):
        w = params[name].astype(jnp.float32)
        cout, cin = w.shape[0], w.shape[1]
        return jnp.transpose(w, (2, 3, 0, 1)).reshape(9, cout, cin).astype(jnp.bfloat16)

    def gb(name):
        return (params[name + '_g'].reshape(-1, 1).astype(jnp.float32),
                params[name + '_b'].reshape(-1, 1).astype(jnp.float32))

    g11, b11 = gb('bn11'); g21, b21 = gb('bn21'); g31, b31 = gb('bn31')
    g41, b41 = gb('bn41'); g51, b51 = gb('bn51')

    # separable bilinear 2x upsample matrices per stage input size: U (2h,h) and U.T (h,2h)
    ups = []
    for h in (H // 16, H // 8, H // 4, H // 2):
        u = _upsample_matrix_np(h)
        ups.append(jnp.asarray(u))
        ups.append(jnp.asarray(u.T))

    args = (i4, i8, i16, i32, i64,
            w9('conv11'), w9('conv21'), w9('conv31'), w9('conv41'),
            w9('conv51'), w9('conv52'),
            g11, b11, g21, b21, g31, b31, g41, b41, g51, b51,
            *ups)

    vmem_spec = pl.BlockSpec(memory_space=pltpu.MemorySpace.VMEM)
    out_flat = pl.pallas_call(
        _make_kernel(N, H),
        out_shape=jax.ShapeDtypeStruct((out_nc, N * H * W), jnp.float32),
        in_specs=[vmem_spec] * len(args),
        out_specs=vmem_spec,
        # peak live set is ~6-8 MiB; 24 MiB keeps ample compile headroom while fitting
        # comfortably inside v7x's 64 MiB per-TensorCore VMEM (was 40 MiB).
        compiler_params=pltpu.CompilerParams(vmem_limit_bytes=24 * 1024 * 1024),
    )(*args)

    # lane-dense (out_nc, N*H*W) -> NCHW, done once by XLA
    return jnp.transpose(out_flat.reshape(out_nc, N, H, W), (1, 0, 2, 3))


# --------------------------------------------------------------------------
# parameters + pure-JAX reference (for a correctness self-check)
# --------------------------------------------------------------------------

def init_params(key, ngf, in_nc, out_nc):
    conv_specs = {
        'conv11': (in_nc, 4 * ngf),
        'conv21': (4 * ngf + in_nc, 4 * ngf),
        'conv31': (4 * ngf + in_nc, 4 * ngf),
        'conv41': (4 * ngf + in_nc, 2 * ngf),
        'conv51': (2 * ngf + in_nc, ngf),
        'conv52': (ngf, out_nc),
    }
    bn_specs = {'bn11': 4 * ngf, 'bn21': 4 * ngf, 'bn31': 4 * ngf,
                'bn41': 2 * ngf, 'bn51': ngf}
    params = {}
    keys = jax.random.split(key, len(conv_specs) + 2 * len(bn_specs))
    ki = 0
    for name, (cin, cout) in conv_specs.items():
        w = jax.random.normal(keys[ki], (cout, cin, 3, 3), jnp.float32)
        params[name] = w / np.sqrt(9.0 * cin)
        ki += 1
    for name, c in bn_specs.items():
        params[name + '_g'] = 1.0 + 0.1 * jax.random.normal(keys[ki], (c,), jnp.float32)
        ki += 1
        params[name + '_b'] = 0.1 * jax.random.normal(keys[ki], (c,), jnp.float32)
        ki += 1
    return params


def netT64_reference(params, Is):
    """Plain-JAX (XLA, f32) reference of the PyTorch forward."""
    x = Is.astype(jnp.float32)

    def pool(v):
        n, c, h, w = v.shape
        return v.reshape(n, c, h // 2, 2, w // 2, 2).mean(axis=(3, 5))

    def conv(v, w):
        return jax.lax.conv_general_dilated(
            v, w, (1, 1), ((1, 1), (1, 1)),
            dimension_numbers=('NCHW', 'OIHW', 'NCHW'),
            precision=jax.lax.Precision.HIGHEST)

    def bn_lrelu(v, g, b):
        mean = v.mean(axis=(0, 2, 3), keepdims=True)
        var = jnp.square(v - mean).mean(axis=(0, 2, 3), keepdims=True)
        y = (v - mean) * jax.lax.rsqrt(var + 1e-5) * g.reshape(1, -1, 1, 1) \
            + b.reshape(1, -1, 1, 1)
        return jnp.where(y >= 0, y, 0.2 * y)

    def up(v):
        n, c, h, w = v.shape
        Uh = jnp.asarray(_upsample_matrix_np(h))
        Uw = jnp.asarray(_upsample_matrix_np(w))
        y = jnp.einsum('oh,nchw->ncow', Uh, v, precision=jax.lax.Precision.HIGHEST)
        return jnp.einsum('pw,ncow->ncop', Uw, y, precision=jax.lax.Precision.HIGHEST)

    I64 = x; I32 = pool(I64); I16 = pool(I32); I8 = pool(I16); I4 = pool(I8)
    z = bn_lrelu(conv(I4, params['conv11']), params['bn11_g'], params['bn11_b'])
    z = jnp.concatenate([up(z), I8], axis=1)
    z = bn_lrelu(conv(z, params['conv21']), params['bn21_g'], params['bn21_b'])
    z = jnp.concatenate([up(z), I16], axis=1)
    z = bn_lrelu(conv(z, params['conv31']), params['bn31_g'], params['bn31_b'])
    z = jnp.concatenate([up(z), I32], axis=1)
    z = bn_lrelu(conv(z, params['conv41']), params['bn41_g'], params['bn41_b'])
    z = jnp.concatenate([up(z), I64], axis=1)
    z = bn_lrelu(conv(z, params['conv51']), params['bn51_g'], params['bn51_b'])
    return conv(z, params['conv52'])          # no tanh in the PyTorch forward


# --------------------------------------------------------------------------

if __name__ == "__main__":
    key = jax.random.PRNGKey(0)
    k_param, k_in = jax.random.split(key)

    ngf, in_nc, out_nc = 4, 3, 3
    N, H, W = 2, 64, 64                       # _netT64 expects 64x64 inputs

    params = init_params(k_param, ngf, in_nc, out_nc)
    Is = jax.random.normal(k_in, (N, in_nc, H, W), jnp.float32)

    fwd = jax.jit(netT64_forward)
    out = fwd(params, Is)
    jax.block_until_ready(out)

    assert out.shape == (N, out_nc, H, W), out.shape
    assert bool(jnp.all(jnp.isfinite(out)))

    # self-check against a plain-JAX f32 reference of the same forward pass.
    # bf16 matmul operands (with f32 accumulation) bound the achievable agreement to ~1e-2.
    ref = jax.jit(netT64_reference)(params, Is)
    jax.block_until_ready(ref)
    rel_err = float(jnp.max(jnp.abs(out - ref)) / (jnp.max(jnp.abs(ref)) + 1e-6))
    assert rel_err < 3e-2, f"mismatch vs reference: rel_err={rel_err}"

    print("KERNEL_OK")
</pallas_src>

<mosaic_0001>
module attributes {stable_mosaic.version = 11 : i64} {
  func.func @kern(%arg0: memref<8x128xf32, #tpu.memory_space<vmem>>, %arg1: memref<8x128xf32, #tpu.memory_space<vmem>>) attributes {dimension_semantics = [], scalar_prefetch = 0 : i64, scratch_operands = 0 : i64, tpu.core_type = #tpu.core_type<tc>} {
    %c0 = arith.constant 0 : index
    %c0_0 = arith.constant 0 : index
    %0 = vector.load %arg0[%c0, %c0_0] : memref<8x128xf32, #tpu.memory_space<vmem>>, vector<8x128xf32>
    %c3_i32 = arith.constant 3 : i32
    %1 = tpu.dynamic_rotate %0 by %c3_i32 dim 1 : vector<8x128xf32>, i32 -> vector<8x128xf32>
    %c0_1 = arith.constant 0 : index
    %c0_2 = arith.constant 0 : index
    %2 = vector.load %arg1[%c0_1, %c0_2] : memref<8x128xf32, #tpu.memory_space<vmem>>, vector<8x128xf32>
    tpu.vector_store %arg1[%c0_1, %c0_2], %1 {strides = array<i32>} : memref<8x128xf32, #tpu.memory_space<vmem>>, vector<8x128xf32>,
    return
  }
}

</mosaic_0001>

<bundles_post_ra>
// kernel: tpu_custom_call.1
= control target key start
LH: loop header
LB: loop body
LE: loop exit
PB: predicated region body
PF: predicated region fallthrough
CT: control target
= control target key end

     0   :  { %6 = vsyncpa [#allocation3], 0  ;;  %s128_s0 = inlined_call_operand.hbm [shape: f32[8,128], index: 0, kind: input, shape index: {}]   ;;  %s129_s1 = inlined_call_operand.hbm [shape: f32[8,128], index: 1, kind: output, shape index: {}]  }
   0x1   :  { %7 = vsyncpa [#allocation4], 0  ;;  %s91_s6 = smov [#allocation2]   ;;  %s43_s10 = scalar_lea.hbm %s128_s0, 128 }
   0x2   :  { %s14_s7 = sshll.u32 %s91_s6, 4  ;;  %p44_p0 = scmp.ne.s32.totalorder %s128_s0, %s43_s10  ;;  %s15_s7 = int_to_ptr.vmem [resolvable:$true] %s14_s7 }
   0x3   :  { %p47_p1 = scmp.lt.u32.totalorder %s43_s10, %s128_s0 }
   0x5   :  { %p49_p2 = pnand %p47_p1, %p44_p0 }
   0x7   :  { %52 = shalt.err (!%p49_p2)
}
   0x8   :  { %s53_s15 = scalar_lea.vmem %s15_s7, 128  ;;  %p58_p4 = scmp.lt.s32.totalorder %s15_s7, %s15_s7 }
   0x9   :  { %p54_p3 = scmp.ne.s32.totalorder %s15_s7, %s53_s15  ;;  %p59_p5 = scmp.lt.s32.totalorder %s53_s15, %s53_s15 }
   0xb   :  { %p60_p6 = por %p59_p5, %p58_p4 }
   0xd   :  { %p61_p7 = pnand %p60_p6, %p54_p3 }
   0xf   :  { %64 = shalt.err (!%p61_p7)
}
  0x10   :  { %17 = dma.hbm_to_vmem [thread:$0]  %s128_s0, 128, %s15_s7, [#allocation3]  }
  0x11   :  { %87 = dma.done.wait [#allocation3], 128  }
  0x12   :  { %88 = vsyncadd [#allocation3], 4294967168  ;;  %v21_v0 = vld [vmem:[#allocation2] sm:$0xff]  ;;  %s92_s18 = smov 3   ;;  %s93_s19 = smov [#allocation5]  }
  0x13   :  { %22 = vrot.lane.b32.xlu0 %v21_v0, %s92_s18  ;;  %s31_s20 = sshll.u32 %s93_s19, 4  ;;  %s32_s20 = int_to_ptr.vmem [resolvable:$true] %s31_s20 }
  0x14   :  { %s65_s21 = scalar_lea.vmem %s32_s20, 128  ;;  %p70_p9 = scmp.lt.s32.totalorder %s32_s20, %s32_s20 }
  0x15   :  { %p66_p8 = scmp.ne.s32.totalorder %s32_s20, %s65_s21  ;;  %p71_p10 = scmp.lt.s32.totalorder %s65_s21, %s65_s21 }
  0x17   :  { %p72_p11 = por %p71_p10, %p70_p9 }
  0x19   :  { %p73_p12 = pnand %p72_p11, %p66_p8 }
  0x85   :  { %v23_v1 = vpop.permute.xlu0 %22 }
  0x86   :  { %24 = vst [vmem:[#allocation5] sm:$0xff] %v23_v1 }
  0x87   :  { %76 = shalt.err (!%p73_p12)
}
  0x88   :  { %s77_s0 = scalar_lea.hbm %s129_s1, 128 }
  0x89   :  { %p78_p13 = scmp.ne.s32.totalorder %s129_s1, %s77_s0  ;;  %p81_p0 = scmp.lt.u32.totalorder %s77_s0, %s129_s1 }
  0x8b   :  { %p83_p1 = pnand %p81_p0, %p78_p13 }
  0x8d   :  { %86 = shalt.err (!%p83_p1)
}
  0x8e   :  { %34 = dma.vmem_to_hbm [thread:$0]  %s32_s20, 128, %s129_s1, [#allocation4]  }
  0x8f   :  { %89 = dma.done.wait [#allocation4], 128  }
  0x90   :  { %90 = vsyncadd [#allocation4], 4294967168 }
  0x91   :  { %38 = vsyncpa [#allocation3], 1 }
  0x92   :  { %39 = vsyncpa [#allocation4], 1 }

</bundles_post_ra>
